<compile_context>
chip_gen: v6e
topology: v6e:2x2x1
jax: 0.10.0
libtpu: 0.0.40
codegen_flags: <defaults>
</compile_context>

<pallas_src>
import jax
import jax.numpy as jnp
from jax.experimental import pallas as pl
from jax.experimental.pallas import tpu as pltpu

LANE = 128


def xw_kernel(x_ref, w_ref, xw_ref):
    # NN layer (DistNNLayer): XW_tile = features_tile @ W_pad, f32 accumulate on
    # the MXU, emitted in the (bf16) streaming dtype used by the aggregation kernel.
    xw_ref[...] = jnp.dot(
        x_ref[...], w_ref[...], preferred_element_type=jnp.float32
    ).astype(xw_ref.dtype)


def agg_kernel(adj_ref, xw_ref, out_ref):
    # Graph layer (DistGraphLayer / spmm): one row tile of out = adj @ XW.
    # XW uses a constant index_map so it stays VMEM-resident across grid steps;
    # there is no sequential carry, so row tiles are independent ("parallel").
    out_ref[...] = jnp.dot(
        adj_ref[...], xw_ref[...], preferred_element_type=jnp.float32
    ).astype(out_ref.dtype)


def tensplit_gcn_forward(features, weight, adj, *, tm=256,
                         stream_dtype=jnp.bfloat16):
    N, in_dim = features.shape
    out_dim = weight.shape[1]
    assert adj.shape == (N, N)

    tm = min(tm, N)
    if N % tm != 0:
        # TODO(synk): for very large, non-tile-divisible graphs pad the row dim
        # instead of collapsing to a single tile.
        tm = N

    # Lane-dense output: pad the tiny class dim up to a multiple of 128 lanes.
    # Padded W columns are zero, so padded output columns are zero and are sliced
    # off below (mirrors the module's world_size pad-then-slice, itself a no-op).
    out_pad = pl.cdiv(out_dim, LANE) * LANE
    w_pad = jnp.pad(weight, ((0, 0), (0, out_pad - out_dim)))

    # ---- NN layer: XW = features @ W_pad, tiled over row tiles. ----
    xw = pl.pallas_call(
        xw_kernel,
        out_shape=jax.ShapeDtypeStruct((N, out_pad), stream_dtype),
        grid_spec=pltpu.PrefetchScalarGridSpec(
            num_scalar_prefetch=0,
            grid=(N // tm,),
            in_specs=[
                pl.BlockSpec((tm, in_dim), lambda i: (i, 0)),
                pl.BlockSpec((in_dim, out_pad), lambda i: (0, 0)),
            ],
            out_specs=pl.BlockSpec((tm, out_pad), lambda i: (i, 0)),
        ),
        compiler_params=pltpu.CompilerParams(
            dimension_semantics=("parallel",),
        ),
    )(features, w_pad)

    # ---- Graph layer: out = adj @ XW, tiled over output rows. ----
    adj_s = adj.astype(stream_dtype)

    itemsize = jnp.dtype(stream_dtype).itemsize
    vmem_limit = int(
        2 * tm * N * itemsize          # double-buffered adj row tile
        + 2 * N * out_pad * itemsize   # VMEM-resident XW (budget 2 buffers)
        + 2 * tm * out_pad * 4         # double-buffered f32 output tile
    )
    vmem_limit = min(max(vmem_limit + (4 << 20), 32 << 20), 64 << 20)

    out_padded = pl.pallas_call(
        agg_kernel,
        out_shape=jax.ShapeDtypeStruct((N, out_pad), jnp.float32),
        grid_spec=pltpu.PrefetchScalarGridSpec(
            num_scalar_prefetch=0,
            grid=(N // tm,),
            in_specs=[
                pl.BlockSpec((tm, N), lambda i: (i, 0)),        # adj row tile (bf16)
                pl.BlockSpec((N, out_pad), lambda i: (0, 0)),   # XW, constant block
            ],
            out_specs=pl.BlockSpec((tm, out_pad), lambda i: (i, 0)),
        ),
        compiler_params=pltpu.CompilerParams(
            dimension_semantics=("parallel",),
            vmem_limit_bytes=vmem_limit,
        ),
    )(adj_s, xw)

    return out_padded[:, :out_dim].astype(features.dtype)


def make_params_and_graph(key, n_nodes, in_dim, out_dim):
    k_w, k_x, k_a = jax.random.split(key, 3)

    # Xavier-uniform init of the single layer weight (matches nn.init.xavier_uniform_).
    bound = (6.0 / (in_dim + out_dim)) ** 0.5
    weight = jax.random.uniform(
        k_w, (in_dim, out_dim), dtype=jnp.float32, minval=-bound, maxval=bound
    )

    # Deterministic node features.
    features = jax.random.normal(k_x, (n_nodes, in_dim), dtype=jnp.float32)

    # Deterministic synthetic adjacency: random sparse-ish binary graph with
    # self loops, row-normalized (dense stand-in for g.adj_full).
    rand = jax.random.uniform(k_a, (n_nodes, n_nodes))
    adj = (rand < 0.05).astype(jnp.float32)
    adj = adj + jnp.eye(n_nodes, dtype=jnp.float32)
    adj = adj / jnp.sum(adj, axis=1, keepdims=True)

    return features, weight, adj


if __name__ == "__main__":
    key = jax.random.PRNGKey(0)
    N, IN_DIM, OUT_DIM = 128, 32, 8   # nodes, g.features.size(1), g.num_classes

    features, weight, adj = make_params_and_graph(key, N, IN_DIM, OUT_DIM)

    out = tensplit_gcn_forward(features, weight, adj, tm=256)
    out = jax.block_until_ready(out)

    # Reference: out = adj @ (features @ W). The world_size pad adds zero columns
    # that are sliced back off -> identity. Tolerance covers the bf16 streaming
    # of adj / XW (f32 accumulation on the MXU).
    ref = adj @ (features @ weight)
    assert out.shape == (N, OUT_DIM)
    assert jnp.allclose(out, ref, atol=2e-2, rtol=2e-2), "mismatch vs reference"

    print("KERNEL_OK")
</pallas_src>

<mosaic_0001>
module attributes {stable_mosaic.version = 11 : i64} {
  func.func @xw_kernel(%arg0: i32, %arg1: memref<128x32xf32, #tpu.memory_space<vmem>>, %arg2: memref<32x128xf32, #tpu.memory_space<vmem>>, %arg3: memref<128x128xbf16, #tpu.memory_space<vmem>>) attributes {dimension_semantics = [#tpu.dimension_semantics<parallel>], iteration_bounds = array<i64: 1>, scalar_prefetch = 0 : i64, scratch_operands = 0 : i64, tpu.core_type = #tpu.core_type<tc>, window_params = [{transform_indices = @transform_0, window_bounds = array<i64: 128, 32>}, {pipeline_mode = #tpu.pipeline_mode<synchronous>, transform_indices = @transform_1, window_bounds = array<i64: 32, 128>}, {transform_indices = @transform_2, window_bounds = array<i64: 128, 128>}]} {
    %c0 = arith.constant 0 : index
    %c0_0 = arith.constant 0 : index
    %0 = vector.load %arg1[%c0, %c0_0] : memref<128x32xf32, #tpu.memory_space<vmem>>, vector<128x32xf32>
    %c0_1 = arith.constant 0 : index
    %c0_2 = arith.constant 0 : index
    %1 = vector.load %arg2[%c0_1, %c0_2] : memref<32x128xf32, #tpu.memory_space<vmem>>, vector<32x128xf32>
    %cst = arith.constant dense<0.000000e+00> : vector<128x128xf32>
    %2 = tpu.matmul %0, %1, %cst {dimension_numbers = #tpu.dot_dimension_numbers<[1], [0], [0], [1], [0, 0, 1, 1], [], []>} : vector<128x32xf32>, vector<32x128xf32>, vector<128x128xf32> -> vector<128x128xf32>
    %3 = arith.truncf %2 : vector<128x128xf32> to vector<128x128xbf16>
    %c0_3 = arith.constant 0 : index
    %c0_4 = arith.constant 0 : index
    %4 = vector.load %arg3[%c0_3, %c0_4] : memref<128x128xbf16, #tpu.memory_space<vmem>>, vector<128x128xbf16>
    tpu.vector_store %arg3[%c0_3, %c0_4], %3 {strides = array<i32>} : memref<128x128xbf16, #tpu.memory_space<vmem>>, vector<128x128xbf16>,
    return
  }
  func.func @transform_0(%arg0: i32) -> (i32, i32) {
    %c0_i32 = arith.constant 0 : i32
    %c0_i32_0 = arith.constant 0 : i32
    return %arg0, %c0_i32 : i32, i32
  }
  func.func @transform_1(%arg0: i32) -> (i32, i32) {
    %c0_i32 = arith.constant 0 : i32
    %c0_i32_0 = arith.constant 0 : i32
    %c0_i32_1 = arith.constant 0 : i32
    return %c0_i32, %c0_i32_0 : i32, i32
  }
  func.func @transform_2(%arg0: i32) -> (i32, i32) {
    %c0_i32 = arith.constant 0 : i32
    %c0_i32_0 = arith.constant 0 : i32
    return %arg0, %c0_i32 : i32, i32
  }
}

</mosaic_0001>

<bundles_post_ra>
// kernel: tpu_custom_call.1
= control target key start
LH: loop header
LB: loop body
LE: loop exit
PB: predicated region body
PF: predicated region fallthrough
CT: control target
= control target key end

     0   :  { %vm32_vm0 = vcmask 261120   ;;  %s599_s0 = inlined_call_operand.vmem [shape: f32[128,32], index: 0, kind: input, shape index: {}]   ;;  %s600_s1 = inlined_call_operand.vmem [shape: f32[32,128], index: 1, kind: input, shape index: {}]   ;;  %s601_s2 = inlined_call_operand.hbm [shape: bf16[128,128], index: 2, kind: output, shape index: {}]  }
   0x1   :  { %v31_v0 = vld [vmem:[%s600_s1 + $0x18] sm:$0xff]  ;;  %v30_v1 = vld [vmem:[%s600_s1 + $0x10] sm:$0xff]  ;;  %v29_v2 = vld [vmem:[%s600_s1 + $0x8] sm:$0xff] }
   0x2   :  { %437 = vmatprep.subr.mxu0 %v31_v0  ;;  %469 = vmatprep.subr.mxu1 %v31_v0  ;;  %v28_v3 = vld [vmem:[%s600_s1] sm:$0xff] }
   0x3   :  { %438 = vmatpush3.msra.mxu0 %v31_v0  ;;  %473 = vmatpush3.msra.mxu1 %v31_v0  ;;  %v12_v4 = vld [vmem:[%s599_s0] sm:$0xff] }
   0x4   :  { %439 = vmatprep.subr.mxu0 %v30_v1  ;;  %470 = vmatprep.subr.mxu1 %v30_v1  ;;  %v20_v5 = vld [vmem:[%s599_s0 + $0x40] sm:$0xff] }
   0x5   :  { %440 = vmatpush3.msra.mxu0 %v30_v1  ;;  %474 = vmatpush3.msra.mxu1 %v30_v1 }
   0x6   :  { %441 = vmatprep.subr.mxu0 %v29_v2  ;;  %471 = vmatprep.subr.mxu1 %v29_v2 }
   0x7   :  { %442 = vmatpush3.msra.mxu0 %v29_v2  ;;  %475 = vmatpush3.msra.mxu1 %v29_v2 }
   0x8   :  { %7 = vsyncpa [#allocation3], 0  ;;  %443 = vmatprep.subr.mxu0 %v28_v3  ;;  %472 = vmatprep.subr.mxu1 %v28_v3  ;;  %v13_v6 = vld [vmem:[%s599_s0 + $0x8] sm:$0xff]  ;;  %v14_v8 = vld [vmem:[%s599_s0 + $0x10] sm:$0xff] }
   0x9   :  { %v21_v7 = vld [vmem:[%s599_s0 + $0x48] sm:$0xff]  ;;  %444 = vmatpush3.msra.mxu0 %v28_v3  ;;  %476 = vmatpush3.msra.mxu1 %v28_v3  ;;  %v22_v9 = vld [vmem:[%s599_s0 + $0x50] sm:$0xff]  ;;  %v15_v10 = vld [vmem:[%s599_s0 + $0x18] sm:$0xff] }
   0xa   :  { %445 = vmatprep.mubr.msk.f32.mxu0 %vm32_vm0, %v12_v4  ;;  %457 = vmatprep.mubr.msk.f32.mxu1 %vm32_vm0, %v20_v5  ;;  %v23_v11 = vld [vmem:[%s599_s0 + $0x58] sm:$0xff]  ;;  %v16_v12 = vld [vmem:[%s599_s0 + $0x20] sm:$0xff]  ;;  %v17_v14 = vld [vmem:[%s599_s0 + $0x28] sm:$0xff] }
   0xb   :  { %446 = vmatmul.mubr.msk.f32.vlgmr.msra.gmra.mxu0 %vm32_vm0, %v13_v6  ;;  %458 = vmatmul.mubr.msk.f32.vlgmr.msra.gmra.mxu1 %vm32_vm0, %v21_v7  ;;  %v24_v13 = vld [vmem:[%s599_s0 + $0x60] sm:$0xff]  ;;  %v25_v15 = vld [vmem:[%s599_s0 + $0x68] sm:$0xff]  ;;  %v18_v16 = vld [vmem:[%s599_s0 + $0x30] sm:$0xff] }
   0xc   :  { %448 = vmatprep.mubr.msk.f32.mxu0 %vm32_vm0, %v14_v8  ;;  %460 = vmatprep.mubr.msk.f32.mxu1 %vm32_vm0, %v22_v9  ;;  %v26_v17 = vld [vmem:[%s599_s0 + $0x70] sm:$0xff]  ;;  %v19_v18 = vld [vmem:[%s599_s0 + $0x38] sm:$0xff] }
   0xd   :  { %v27_v19 = vld [vmem:[%s599_s0 + $0x78] sm:$0xff]  ;;  %s502_s0 = smov [#allocation2]  }
   0xe   :  { %s311_s20 = sshll.u32 %s502_s0, 4  ;;  %s312_s20 = int_to_ptr.vmem [resolvable:$true] %s311_s20 }
   0xf   :  { %449 = vmatmul.mubr.msk.f32.gmra.mxu0 %vm32_vm0, %v15_v10  ;;  %461 = vmatmul.mubr.msk.f32.gmra.mxu1 %vm32_vm0, %v23_v11  ;;  %s480_s21 = scalar_lea.vmem %s312_s20, 1024  ;;  %p485_p1 = scmp.lt.s32.totalorder %s312_s20, %s312_s20 }
  0x10   :  { %451 = vmatprep.mubr.msk.f32.mxu0 %vm32_vm0, %v16_v12  ;;  %463 = vmatprep.mubr.msk.f32.mxu1 %vm32_vm0, %v24_v13  ;;  %p481_p0 = scmp.ne.s32.totalorder %s312_s20, %s480_s21  ;;  %p486_p2 = scmp.lt.s32.totalorder %s480_s21, %s480_s21 }
  0x12   :  { %p487_p3 = por %p486_p2, %p485_p1 }
  0x13   :  { %452 = vmatmul.mubr.msk.f32.gmra.mxu0 %vm32_vm0, %v17_v14  ;;  %464 = vmatmul.mubr.msk.f32.gmra.mxu1 %vm32_vm0, %v25_v15 }
  0x14   :  { %454 = vmatprep.mubr.msk.f32.mxu0 %vm32_vm0, %v18_v16  ;;  %466 = vmatprep.mubr.msk.f32.mxu1 %vm32_vm0, %v26_v17  ;;  %p488_p4 = pnand %p487_p3, %p481_p0 }
  0x17   :  { %455 = vmatmul.mubr.msk.f32.gmra.mxu0 %vm32_vm0, %v19_v18  ;;  %467 = vmatmul.mubr.msk.f32.gmra.mxu1 %vm32_vm0, %v27_v19 }
  0xcb   :  { %v447_v20 = vpop.f32.mrf.mxu0  ;;  %v459_v21 = vpop.f32.mrf.mxu1 }
  0xcd   :  { %v147_v22 = vpop.f32.mrf.mxu0  ;;  %v187_v23 = vpop.f32.mrf.mxu1 }
  0xce   :  { %v373_v24 = vpack.c.bf16 %v447_v20, %v147_v22  ;;  %v393_v25 = vpack.c.bf16 %v459_v21, %v187_v23 }
  0xcf   :  { %v450_v26 = vpop.f32.mrf.mxu0  ;;  %v462_v27 = vpop.f32.mrf.mxu1 }
  0xd0   :  { %374 = vst [vmem:[#allocation2] sm:$0xff] %v373_v24   ;;  %413 = vst [vmem:[#allocation2 + $0x20] sm:$0xff] %v393_v25  }
  0xd1   :  { %v157_v28 = vpop.f32.mrf.mxu0  ;;  %v197_v29 = vpop.f32.mrf.mxu1 }
  0xd2   :  { %v378_v30 = vpack.c.bf16 %v450_v26, %v157_v28  ;;  %v398_v31 = vpack.c.bf16 %v462_v27, %v197_v29 }
  0xd3   :  { %v453_v32 = vpop.f32.mrf.mxu0  ;;  %v465_v33 = vpop.f32.mrf.mxu1 }
  0xd4   :  { %410 = vst [vmem:[#allocation2 + $0x8] sm:$0xff] %v378_v30   ;;  %414 = vst [vmem:[#allocation2 + $0x28] sm:$0xff] %v398_v31  }
  0xd5   :  { %v167_v34 = vpop.f32.mrf.mxu0  ;;  %v207_v35 = vpop.f32.mrf.mxu1 }
  0xd6   :  { %v383_v36 = vpack.c.bf16 %v453_v32, %v167_v34  ;;  %v403_v37 = vpack.c.bf16 %v465_v33, %v207_v35 }
  0xd7   :  { %v456_v38 = vpop.f32.mrf.mxu0  ;;  %v468_v39 = vpop.f32.mrf.mxu1 }
  0xd8   :  { %411 = vst [vmem:[#allocation2 + $0x10] sm:$0xff] %v383_v36   ;;  %415 = vst [vmem:[#allocation2 + $0x30] sm:$0xff] %v403_v37  }
  0xd9   :  { %v177_v40 = vpop.f32.mrf.mxu0  ;;  %v217_v41 = vpop.f32.mrf.mxu1 }
  0xda   :  { %v388_v42 = vpack.c.bf16 %v456_v38, %v177_v40  ;;  %v408_v43 = vpack.c.bf16 %v468_v39, %v217_v41 }
  0xdc   :  { %412 = vst [vmem:[#allocation2 + $0x18] sm:$0xff] %v388_v42   ;;  %416 = vst [vmem:[#allocation2 + $0x38] sm:$0xff] %v408_v43  }
  0xdd   :  { %491 = shalt.err (!%p488_p4)
}
  0xde   :  { %s503_s22 = smov 64   ;;  %s504_s1 = smov 4  }
  0xdf   :  { %317 = dma.vmem_to_hbm [thread:$0]  %s312_s20, 1024, %s601_s2, [#allocation3], %s503_s22, %s503_s22, %s504_s1  }
  0xe0   :  { %500 = dma.done.wait [#allocation3], 1024  }
  0xe1   :  { %501 = vsyncadd [#allocation3], 4294966272 }
  0xe2   :  { %321 = vsyncpa [#allocation3], 1 }

</bundles_post_ra>
